<compile_context>
chip_gen: v7x
topology: tpu7x:2x2x1
jax: 0.10.0
libtpu: 0.0.40
codegen_flags: <defaults>
</compile_context>

<pallas_src>
import functools

import jax
import jax.numpy as jnp
from jax import lax
from jax.experimental import pallas as pl
from jax.experimental.pallas import tpu as pltpu


def _sar_kernel(x_ref, w_ref, b_ref, o_ref, *, tb, ch, n, s):
    # x_ref: (tb*ch*n, s) native dtype | w_ref: (ch, n, 1) f32 (pre-scaled 1/s)
    # b_ref: (ch, 1) f32 (pre-scaled 1/s) | o_ref: (1, 1, tb*ch*n) f32
    # The reshape only splits the sublane dim (n == 8 tile boundary), so it is
    # layout-preserving; the f32 upcast happens in VMEM after the HBM load.
    x = x_ref[...].astype(jnp.float32).reshape(tb, ch, n, s)   # (tb, ch, n, s)
    w = w_ref[...]                                             # (ch, n, 1)
    b = b_ref[...]                                             # (ch, 1)

    # Grouped 1x1 conv, pre-scaled by 1/(W*W): sublane reduce over n_in.
    mask = jnp.sum(w[None] * x, axis=2) + b[None]              # (tb, ch, s) == mask/S

    # Fused attention weighting + spatial average pool (mean factor already
    # folded into mask); the (tb, ch, n, s) mask_x is never stored.
    pooled = jnp.sum(mask[:, :, None, :] * x, axis=-1)         # (tb, ch, n)

    # squash along the n_in axis. Keep xq-first ordering so padded zero rows
    # stay finite (xq == 0 => scale == 0, no inf/NaN).
    xq = jnp.sum(pooled * pooled, axis=-1, keepdims=True)      # (tb, ch, 1)
    scale = xq * pl.reciprocal(1.0 + xq, approx=False) * lax.rsqrt(xq + 1e-7)
    out = scale * pooled                                       # (tb, ch, n)

    # Lane-dense store: flatten to a single row (multiple of 128 when tb*ch*n
    # is, so the vst is unmasked).
    o_ref[...] = out.reshape(1, 1, tb * ch * n).astype(o_ref.dtype)


def _choose_batch_block(B, C, N, S, itemsize, target_block_bytes):
    """Pick the per-grid-step batch block size tb.

    Preferences (per perf review):
      * ~target_block_bytes of x per block (amortize ~0.35 us per-step cost),
      * nb >= 2 whenever B >= 2 so the "parallel" axis feeds both v7x TCs,
      * tb divides B (avoids the zero-pad full-tensor HBM copy),
      * rows = tb*C*N a multiple of 128 (lane-dense output store), else of 8.
    Returns (tb, needs_padding).
    """
    rows_per_b = C * N
    bytes_per_b = rows_per_b * S * itemsize
    cap = max(1, min(B, int(target_block_bytes // max(1, bytes_per_b))))
    if B >= 2:
        cap = min(cap, (B + 1) // 2)      # guarantee nb >= 2 (both v7x cores busy)

    tb_div = None
    for mult in (128, 8):
        for tb in range(cap, 0, -1):
            if B % tb == 0 and (tb * rows_per_b) % mult == 0:
                tb_div = tb
                break
        if tb_div is not None:
            break
    # Accept the divisor-aligned choice unless it leaves blocks tiny compared
    # with the byte cap; tiny blocks cost far more in per-step overhead than
    # one zero-padding pass over x.
    if tb_div is not None and tb_div * 4 >= cap:
        return tb_div, False

    for mult in (128, 8):
        for tb in range(cap, 0, -1):
            if (tb * rows_per_b) % mult == 0:
                return tb, True
    # Last resort: one block over the whole batch; block dims equal the full
    # array dims, which is always tile-legal (may need more VMEM for huge B).
    return B, False


def self_attention_routing_cplct(x, conv_w, conv_b, *, target_block_bytes=4 << 20):
    """x: (B, ch_in, n_in, w_in, w_in); conv_w: (ch_in, n_in); conv_b: (ch_in,).

    x may be float32 or bfloat16 (bf16 halves HBM read traffic; the kernel
    upcasts to f32 in VMEM — relax the 1e-5 reference check for that path).
    """
    B, C, N, W, _ = x.shape
    S = W * W
    itemsize = jnp.dtype(x.dtype).itemsize

    tb, pad = _choose_batch_block(B, C, N, S, itemsize, target_block_bytes)
    nb = pl.cdiv(B, tb)
    Bp = nb * tb
    rows = tb * C * N               # rows per block

    # Lane-dense 2D slab in the input's native dtype (no wrapper f32 cast of x).
    x2d = x.reshape(B, C * N * S)
    if pad and Bp != B:
        # Fallback only (B with no useful divisor): one extra HBM pass over x,
        # cheaper than running many tiny blocks. Zero rows are numerically safe
        # through squash (xq == 0 => output 0) and are sliced away below.
        x2d = jnp.pad(x2d, ((0, Bp - B), (0, 0)))
    x2d = x2d.reshape(Bp * C * N, S)

    # Fold the 1/(W*W) average-pool factor into the conv parameters (exact for
    # power-of-two W*W), so the kernel pooling is a pure multiply + lane-sum.
    inv_s = 1.0 / S
    w3 = (conv_w.astype(jnp.float32) * inv_s).reshape(C, N, 1)   # n_in on sublanes
    b2 = (conv_b.astype(jnp.float32) * inv_s).reshape(C, 1)

    # VMEM budget: double-buffered native-dtype x block + a few f32 block-sized
    # temporaries (upcast / elementwise product). Capped at 48 MiB to stay well
    # inside v7x's 64 MiB physical VMEM (v5e/v6e have 128 MiB).
    block_in = rows * S * itemsize
    block_f32 = rows * S * 4
    vmem_limit = int(min(48 << 20,
                         max(32 << 20, 2 * block_in + 4 * block_f32 + (2 << 20))))

    kernel = functools.partial(_sar_kernel, tb=tb, ch=C, n=N, s=S)

    out = pl.pallas_call(
        kernel,
        out_shape=jax.ShapeDtypeStruct((nb, 1, rows), jnp.float32),
        grid_spec=pltpu.PrefetchScalarGridSpec(
            num_scalar_prefetch=0,
            grid=(nb,),
            in_specs=[
                pl.BlockSpec((rows, S), lambda i: (i, 0)),        # x slab block
                pl.BlockSpec((C, N, 1), lambda i: (0, 0, 0)),     # scaled conv weight
                pl.BlockSpec((C, 1), lambda i: (0, 0)),           # scaled conv bias
            ],
            out_specs=pl.BlockSpec((1, 1, rows), lambda i: (i, 0, 0)),
        ),
        compiler_params=pltpu.CompilerParams(
            dimension_semantics=("parallel",),   # batch blocks -> both v7x TCs
            vmem_limit_bytes=vmem_limit,
        ),
    )(x2d, w3, b2)

    # Match PyTorch output shape (B, ch_in, n_in, 1, 1); drop any batch padding.
    out = out.reshape(Bp, C, N)[:B]
    return out.reshape(B, C, N, 1, 1)


def _reference(x, conv_w, conv_b):
    mask = jnp.einsum("cj,bcjhw->bchw", conv_w, x) + conv_b[None, :, None, None]
    mask_x = mask[:, :, None, :, :] * x
    pooled = jnp.mean(mask_x, axis=(3, 4), keepdims=True)       # (B, C, N, 1, 1)
    xq = jnp.sum(pooled * pooled, axis=2, keepdims=True)
    return xq / (1.0 + xq) * (pooled / jnp.sqrt(xq + 1e-7))


if __name__ == "__main__":
    # Shapes consistent with the module: ch_in=4 capsule types, n_in=8 capsule
    # dim, w_in=16 spatial, batch=2.
    B, ch_in, n_in, w_in = 2, 4, 8, 16

    key = jax.random.PRNGKey(0)
    kx, kw, kb = jax.random.split(key, 3)
    x = jax.random.normal(kx, (B, ch_in, n_in, w_in, w_in), dtype=jnp.float32)
    # Conv2d weight (ch_in, n_in, 1, 1) squeezed, bias (ch_in,).
    conv_w = jax.random.normal(kw, (ch_in, n_in), dtype=jnp.float32) * 0.1
    conv_b = jax.random.normal(kb, (ch_in,), dtype=jnp.float32) * 0.1

    out = self_attention_routing_cplct(x, conv_w, conv_b)
    out = jax.block_until_ready(out)

    ref = _reference(x, conv_w, conv_b)
    assert out.shape == (B, ch_in, n_in, 1, 1)
    max_err = float(jnp.max(jnp.abs(out - ref)))
    assert jnp.allclose(out, ref, atol=1e-5, rtol=1e-5), max_err
    print("KERNEL_OK")
</pallas_src>

<mosaic_0001>
module attributes {stable_mosaic.version = 11 : i64} {
  func.func @_sar_kernel(%arg0: i32, %arg1: memref<32x256xf32, #tpu.memory_space<vmem>>, %arg2: memref<4x8x1xf32, #tpu.memory_space<vmem>>, %arg3: memref<4x1xf32, #tpu.memory_space<vmem>>, %arg4: memref<1x1x32xf32, #tpu.memory_space<vmem>>) attributes {dimension_semantics = [#tpu.dimension_semantics<parallel>], iteration_bounds = array<i64: 2>, scalar_prefetch = 0 : i64, scratch_operands = 0 : i64, tpu.core_type = #tpu.core_type<tc>, window_params = [{transform_indices = @transform_0, window_bounds = array<i64: 32, 256>}, {pipeline_mode = #tpu.pipeline_mode<synchronous>, transform_indices = @transform_1, window_bounds = array<i64: 4, 8, 1>}, {pipeline_mode = #tpu.pipeline_mode<synchronous>, transform_indices = @transform_2, window_bounds = array<i64: 4, 1>}, {transform_indices = @transform_3, window_bounds = array<i64: 1, 1, 32>}]} {
    %c0 = arith.constant 0 : index
    %c0_0 = arith.constant 0 : index
    %0 = vector.load %arg1[%c0, %c0_0] : memref<32x256xf32, #tpu.memory_space<vmem>>, vector<32x256xf32>
    %1 = vector.shape_cast %0 : vector<32x256xf32> to vector<1x4x8x256xf32>
    %c0_1 = arith.constant 0 : index
    %c0_2 = arith.constant 0 : index
    %c0_3 = arith.constant 0 : index
    %2 = vector.load %arg2[%c0_1, %c0_2, %c0_3] : memref<4x8x1xf32, #tpu.memory_space<vmem>>, vector<4x8x1xf32>
    %c0_4 = arith.constant 0 : index
    %c0_5 = arith.constant 0 : index
    %3 = vector.load %arg3[%c0_4, %c0_5] : memref<4x1xf32, #tpu.memory_space<vmem>>, vector<4x1xf32>
    %4 = vector.shape_cast %2 : vector<4x8x1xf32> to vector<1x4x8x1xf32>
    %5 = vector.broadcast %4 : vector<1x4x8x1xf32> to vector<1x4x8x256xf32>
    %6 = arith.mulf %5, %1 : vector<1x4x8x256xf32>
    %cst = arith.constant dense<0.000000e+00> : vector<1x4x256xf32>
    %7 = vector.multi_reduction <add>, %6, %cst [2] : vector<1x4x8x256xf32> to vector<1x4x256xf32>
    %8 = vector.shape_cast %3 : vector<4x1xf32> to vector<1x4x1xf32>
    %9 = vector.broadcast %8 : vector<1x4x1xf32> to vector<1x4x256xf32>
    %10 = arith.addf %7, %9 : vector<1x4x256xf32>
    %11 = vector.shape_cast %10 : vector<1x4x256xf32> to vector<1x4x1x256xf32>
    %12 = vector.broadcast %11 : vector<1x4x1x256xf32> to vector<1x4x8x256xf32>
    %13 = arith.mulf %12, %1 : vector<1x4x8x256xf32>
    %cst_6 = arith.constant dense<0.000000e+00> : vector<1x4x8xf32>
    %14 = vector.multi_reduction <add>, %13, %cst_6 [3] : vector<1x4x8x256xf32> to vector<1x4x8xf32>
    %15 = arith.mulf %14, %14 : vector<1x4x8xf32>
    %cst_7 = arith.constant dense<0.000000e+00> : vector<1x4xf32>
    %16 = vector.multi_reduction <add>, %15, %cst_7 [2] : vector<1x4x8xf32> to vector<1x4xf32>
    %17 = vector.shape_cast %16 : vector<1x4xf32> to vector<1x4x1xf32>
    %cst_8 = arith.constant 1.000000e+00 : f32
    %18 = vector.broadcast %cst_8 : f32 to vector<1x4x1xf32>
    %19 = arith.addf %18, %17 : vector<1x4x1xf32>
    %20 = tpu.reciprocal %19 : vector<1x4x1xf32> -> vector<1x4x1xf32>
    %21 = arith.mulf %17, %20 : vector<1x4x1xf32>
    %cst_9 = arith.constant 1.000000e-07 : f32
    %22 = vector.broadcast %cst_9 : f32 to vector<1x4x1xf32>
    %23 = arith.addf %17, %22 : vector<1x4x1xf32>
    %24 = math.rsqrt %23 : vector<1x4x1xf32>
    %25 = arith.mulf %21, %24 : vector<1x4x1xf32>
    %26 = vector.broadcast %25 : vector<1x4x1xf32> to vector<1x4x8xf32>
    %27 = arith.mulf %26, %14 : vector<1x4x8xf32>
    %28 = vector.shape_cast %27 : vector<1x4x8xf32> to vector<1x1x32xf32>
    %c0_10 = arith.constant 0 : index
    %c0_11 = arith.constant 0 : index
    %c0_12 = arith.constant 0 : index
    %29 = vector.load %arg4[%c0_10, %c0_11, %c0_12] : memref<1x1x32xf32, #tpu.memory_space<vmem>>, vector<1x1x32xf32>
    tpu.vector_store %arg4[%c0_10, %c0_11, %c0_12], %28 {strides = array<i32>} : memref<1x1x32xf32, #tpu.memory_space<vmem>>, vector<1x1x32xf32>,
    return
  }
  func.func @transform_0(%arg0: i32) -> (i32, i32) {
    %c0_i32 = arith.constant 0 : i32
    %c0_i32_0 = arith.constant 0 : i32
    return %arg0, %c0_i32 : i32, i32
  }
  func.func @transform_1(%arg0: i32) -> (i32, i32, i32) {
    %c0_i32 = arith.constant 0 : i32
    %c0_i32_0 = arith.constant 0 : i32
    %c0_i32_1 = arith.constant 0 : i32
    %c0_i32_2 = arith.constant 0 : i32
    return %c0_i32, %c0_i32_0, %c0_i32_1 : i32, i32, i32
  }
  func.func @transform_2(%arg0: i32) -> (i32, i32) {
    %c0_i32 = arith.constant 0 : i32
    %c0_i32_0 = arith.constant 0 : i32
    %c0_i32_1 = arith.constant 0 : i32
    return %c0_i32, %c0_i32_0 : i32, i32
  }
  func.func @transform_3(%arg0: i32) -> (i32, i32, i32) {
    %c0_i32 = arith.constant 0 : i32
    %c0_i32_0 = arith.constant 0 : i32
    %c0_i32_1 = arith.constant 0 : i32
    return %arg0, %c0_i32, %c0_i32_0 : i32, i32, i32
  }
}

</mosaic_0001>

<bundles_post_ra>
// kernel: tpu_custom_call.1
= control target key start
LH: loop header
LB: loop body
LE: loop exit
PB: predicated region body
PF: predicated region fallthrough
CT: control target
= control target key end

     0   :  { %8 = vsyncpa [#allocation3], 0  ;;  %s983_s0 = inlined_call_operand.hbm [shape: f32[64,256], index: 0, kind: input, shape index: {}]   ;;  %s984_s1 = inlined_call_operand.vmem [shape: f32[4,8,1], index: 1, kind: input, shape index: {}]   ;;  %s985_s2 = inlined_call_operand.vmem [shape: f32[4,1], index: 2, kind: input, shape index: {}]   ;;  %s986_s3 = inlined_call_operand.hbm [shape: f32[2,1,32], index: 3, kind: output, shape index: {}]  }
   0x1   :  { %10 = vsyncpa [#allocation3 + $0x1], 0 }
   0x2   :  { %11 = vsyncpa [#allocation4], 0 }
   0x3   :  { %13 = vsyncpa [#allocation4 + $0x1], 0  ;;  %s745_s12 = smov 0   ;;  %s747_s13 = smov 0  }
   0x4   :  { %s749_s14 = smov 0   ;;  %s751_s15 = smov 0  }
   0x5 LB: > { %s766_s16 = sadd.s32 4294967295, %s712_s15   ;;  %s541_s17 = sadd.s32 4294967294, %s712_s15   ;;  %s712_s15 = sphi %s751_s15, %s999_s15   ;;  %s708_s14 = sphi %s749_s14, %s998_s14   ;;  %s704_s13 = sphi %s747_s13, %s997_s13   ;;  %s700_s12 = sphi %s745_s12, %s996_s12  }
   0x6   : > { %s770_s18 = sadd.s32 1, %s712_s15   ;;  %s26_s19 = sadd.s32 1, %s708_s14 }
   0x7   : > { %s23_s20 = ssub.s32 %s712_s15, %s770_s18  ;;  %p33_p0 = scmp.ne.s32.totalorder %s708_s14, %s704_s13 }
   0x8   : > { %p24_p1 = scmp.eq.s32.totalorder %s23_s20, 0  ;;  %p34_p2 = scmp.eq.s32.totalorder %s712_s15, 0 }
   0x9   : > { %p39_p3 = scmp.ne.s32.totalorder %s704_s13, %s700_s12  ;;  %p40_p4 = scmp.eq.s32.totalorder %s766_s16, 0 }
   0xa   : > { %s782_s21 = scalar_select %p24_p1, %s708_s14, %s26_s19  }
   0xb   : > { %p784_p5 = por %p34_p2, %p33_p0  ;;  %p788_p6 = por %p40_p4, %p39_p3 }
   0xc   : > { %p105_p7 = scmp.eq.s32.totalorder %s766_s16, 1  ;;  %p111_p8 = scmp.eq.s32.totalorder %s541_s17, 1 }
   0xd   : > { %p567_p10 = scmp.lt.s32.totalorder %s712_s15, 2  ;;  %s137_s26 = sand.u32 1, %s708_s14  }
   0xe   : > { %p795_p11 = por %p105_p7, %p33_p0  ;;  %p799_p12 = por %p111_p8, %p39_p3 }
   0xf   : > { %s554_s27 = sshll.u32 %s712_s15, 10  ;;  %s544_s28 = sshll.u32 %s137_s26, 6 }
  0x10   : > { %s990_s24 = scalar_select %p795_p11, 1, 0 }
  0x11   : > { %s991_s25 = scalar_select %p799_p12, 1, 0 }
  0x12   : > { %s808_s4 = scalar_lea.hbm %s983_s0, %s554_s27  ;;  %s141_s5 = scalar_lea.vmem [#allocation2], %s544_s28 }
  0x13   : > { %s149_s6 = sshll.u32 %s141_s5, 4  ;;  %p812_p13 = pnand %p567_p10, %p784_p5  ;;  %s816_s6 = int_to_ptr.vmem [resolvable:$true] %s149_s6 }
  0x14   : > { %s818_s8 = scalar_lea.sflag [#allocation3], %s137_s26  ;;  %s616_s9 = scalar_lea.hbm %s808_s4, 1024 }
  0x15   : > { %p617_p0 = scmp.ne.s32.totalorder %s808_s4, %s616_s9  ;;  %p618_p1 = pneg %p812_p13 }
  0x16   : > { %s621_s17 = scalar_lea.hbm %s983_s0, 2048  ;;  %p622_p4 = scmp.lt.u32.totalorder %s808_s4, %s983_s0 }
  0x17   : > { %p619_p2 = pnand %p618_p1, %p617_p0  ;;  %p623_p5 = scmp.lt.u32.totalorder %s621_s17, %s616_s9 }
  0x18   : > { %p625_p8 = scmp.lt.u32.totalorder %s616_s9, %s808_s4 }
  0x19   : > { %p620_p3 = pneg %p619_p2  ;;  %p624_p7 = por %p623_p5, %p622_p4 }
  0x1b   : > { %p626_p10 = por %p625_p8, %p624_p7 }
  0x1d   : > { %p627_p9 = pnand %p626_p10, %p620_p3 }
  0x1f   : > { %630 = shalt.err (!%p627_p9)
}
  0x20   : > { %s631_s22 = scalar_lea.vmem %s816_s6, 1024  ;;  %s714_s26 = smov [#allocation2]  }
  0x21   : > { %p632_p0 = scmp.ne.s32.totalorder %s816_s6, %s631_s22  ;;  %s636_s27 = sshll.u32 %s714_s26, 4  ;;  %s637_s27 = int_to_ptr.vmem [resolvable:$false] %s636_s27 }
  0x22   : > { %s638_s28 = scalar_lea.vmem %s637_s27, 2048  ;;  %p639_p11 = scmp.lt.s32.totalorder %s816_s6, %s637_s27 }
  0x23   : > { %p634_p2 = pnand %p632_p0, %p618_p1  ;;  %p640_p4 = scmp.lt.s32.totalorder %s638_s28, %s631_s22 }
  0x25   : > { %p635_p12 = pneg %p634_p2  ;;  %p641_p5 = por %p640_p4, %p639_p11 }
  0x27   : > { %p642_p7 = pnand %p641_p5, %p635_p12 }
  0x29   : > { %645 = shalt.err (!%p642_p7)
}
  0x2a   : > { %s715_s29 = smov 256   ;;  %s716_s30 = smov 16  }
  0x2b   : > { %562 = dma.hbm_to_vmem [thread:$0]  (!%p812_p13), %s808_s4, 1024, %s816_s6, %s818_s8, %s715_s29, %s715_s29, %s716_s30  }
  0x2c   : > { %p548_p9 = scmp.ge.s32.totalorder %s712_s15, 1  ;;  %p157_p1 = scmp.lt.s32.totalorder %s712_s15, 3 }
  0x2e   : > { %p158_p3 = pnand %p548_p9, %p157_p1 }
  0x2f   : > { %s849_s5 = sand.u32 (!%p158_p3), 1, %s704_s13  }
  0x30   : > { %161 = sbr.rel (%p158_p3) target bundleno = 667 (0x29b), region = 32  ;;  %s549_s9 = sshll.u32 (!%p158_p3), %s849_s5, 6 }
  0x31   : > { %s164_s10 = scalar_lea.sflag (!%p158_p3), [#allocation3], %s849_s5  ;;  %s853_s11 = scalar_lea.vmem (!%p158_p3), [#allocation2], %s549_s9 }
  0x37   : > { %691 = dma.done.wait (%p788_p6), %s164_s10, 1024  }
  0x38   : > { %693 = vsyncadd (%p788_p6), %s164_s10, 4294966272  ;;  %v717_v0 = vmov 0   ;;  %v200_v1 = vld [vmem:[%s984_s1 + $0x10] sm:$0xff]  ;;  %v198_v2 = vld [vmem:[%s984_s1] sm:$0xff]  ;;  %v298_v6 = vlaneseq  ;;  %vm376_vm0 = vcmask 1041409   ;;  %vm378_vm1 = vcmask 1042434  }
  0x39   : > { %611 = vset.pattern.permute.xlu1 %v717_v0  ;;  %610 = vset.pattern.permute.xlu0 %v717_v0  ;;  %v201_v3 = vld [vmem:[%s984_s1 + $0x18] sm:$0xff]  ;;  %v199_v4 = vld [vmem:[%s984_s1 + $0x8] sm:$0xff]  ;;  %v202_v5 = vld [vmem:[%s985_s2] sm:$0xf]  ;;  %vm380_vm2 = vcmask 1043459   ;;  %vm383_vm3 = vcmask 60416  }
  0x3a   : > { %215 = vperm.xlu1 %611, %v200_v1   ;;  %205 = vperm.xlu0 %610, %v198_v2   ;;  %v875_v7 = vld [vmem:[%s853_s11 + $0x20] sm:$0xff]  ;;  %v878_v8 = vld [vmem:[%s853_s11 + $0x28] sm:$0xff]  ;;  %v887_v13 = vshrl.u32 %v298_v6, 7  ;;  %v894_v18 = vld [vmem:[%s853_s11 + $0x30] sm:$0xff]  ;;  %s721_s27 = smov 8   ;;  %s722_s28 = smov 16  }
  0x3b   : > { %v881_v9 = vld [vmem:[%s853_s11] sm:$0xff]  ;;  %v884_v10 = vld [vmem:[%s853_s11 + $0x8] sm:$0xff]  ;;  %v897_v19 = vld [vmem:[%s853_s11 + $0x38] sm:$0xff]  ;;  %s723_s29 = smov 24   ;;  %vm454_vm4 = vcmask 64512   ;;  %vm456_vm5 = vcmask 130048  }
  0x3c   : > { %v900_v24 = vld [vmem:[%s853_s11 + $0x10] sm:$0xff]  ;;  %v903_v25 = vld [vmem:[%s853_s11 + $0x18] sm:$0xff]  ;;  %v906_v28 = vsub.s32 0, %v887_v13  ;;  %s550_s30 = sshll.u32 %s766_s16, 4  ;;  %s188_s9 = scalar_lea.vmem [#allocation5], %s849_s5  ;;  %vm458_vm6 = vcmask 195584  }
  0x3d   : > { %s475_s10 = sshll.u32 %s188_s9, 4  ;;  %vm460_vm7 = vcmask 253952   ;;  %s939_s6 = scalar_lea.hbm %s986_s3, %s550_s30  ;;  %s941_s10 = int_to_ptr.vmem [resolvable:$true] %s475_s10 }
  0x3e   : > { %220 = vperm.xlu1 %611, %v201_v3   ;;  %210 = vperm.xlu0 %610, %v199_v4   ;;  %s463_s7 = scalar_lea.sflag [#allocation4], %s849_s5  ;;  %s646_s16 = scalar_lea.vmem %s941_s10, 16 }
  0x3f   : > { %p647_p6 = scmp.ne.s32.totalorder %s941_s10, %s646_s16  ;;  %p993_p11 = scmp.ne.s32.totalorder %s990_s24, 0 }
  0x40   : > { %s724_s8 = smov [#allocation5]  }
  0x41   : > { %p648_p12 = pnand %p647_p6, %p993_p11  ;;  %s650_s17 = sshll.u32 %s724_s8, 4  ;;  %s651_s17 = int_to_ptr.vmem [resolvable:$false] %s650_s17 }
  0x42   : > { %281 = vperm.xlu0 %610, %v202_v5   ;;  %s652_s23 = scalar_lea.vmem %s651_s17, 32  ;;  %p653_p8 = scmp.lt.s32.totalorder %s941_s10, %s651_s17 }
  0x43   : > { %p649_p13 = pneg %p648_p12  ;;  %p654_p10 = scmp.lt.s32.totalorder %s652_s23, %s646_s16 }
  0x45   : > { %p655_p0 = por %p654_p10, %p653_p8 }
  0x47   : > { %p656_p2 = pnand %p655_p0, %p649_p13 }
  0xb9   : > { %v216_v11 = vpop.permute.xlu1 %215  ;;  %v206_v12 = vpop.permute.xlu0 %205 }
  0xba   : > { %v227_v14 = vmul.f32 %v216_v11, %v875_v7  ;;  %v228_v15 = vmul.f32 %v216_v11, %v878_v8  ;;  %v223_v16 = vmul.f32 %v206_v12, %v881_v9  ;;  %v224_v17 = vmul.f32 %v206_v12, %v884_v10 }
  0xbc   : > { %v255_v20 = vrot.slane %v227_v14, 4  ;;  %v261_v21 = vrot.slane %v228_v15, 4  ;;  %v231_v22 = vrot.slane %v223_v16, 4  ;;  %v237_v23 = vrot.slane %v224_v17, 4 }
  0xbd   : > { %v221_v26 = vpop.permute.xlu1 %220  ;;  %v211_v27 = vpop.permute.xlu0 %210 }
  0xbe   : > { %v256_v29 = vadd.f32 %v255_v20, %v227_v14  ;;  %v262_v30 = vadd.f32 %v261_v21, %v228_v15  ;;  %v232_v31 = vadd.f32 %v231_v22, %v223_v16  ;;  %v238_v32 = vadd.f32 %v237_v23, %v224_v17 }
  0xbf   : > { %v229_v33 = vmul.f32 %v221_v26, %v894_v18  ;;  %v230_v34 = vmul.f32 %v221_v26, %v897_v19  ;;  %v225_v35 = vmul.f32 %v211_v27, %v900_v24  ;;  %v226_v36 = vmul.f32 %v211_v27, %v903_v25 }
  0xc0   : > { %v257_v37 = vrot.slane %v256_v29, 2  ;;  %v263_v38 = vrot.slane %v262_v30, 2  ;;  %v233_v39 = vrot.slane %v232_v31, 2  ;;  %v239_v40 = vrot.slane %v238_v32, 2 }
  0xc1   : > { %v267_v41 = vrot.slane %v229_v33, 4  ;;  %v273_v42 = vrot.slane %v230_v34, 4  ;;  %v243_v43 = vrot.slane %v225_v35, 4  ;;  %v249_v44 = vrot.slane %v226_v36, 4  ;;  %v282_v61 = vpop.permute.xlu0 %281 }
  0xc2   : > { %v258_v45 = vadd.f32 %v257_v37, %v256_v29  ;;  %v264_v46 = vadd.f32 %v263_v38, %v262_v30  ;;  %v234_v47 = vadd.f32 %v233_v39, %v232_v31  ;;  %v240_v48 = vadd.f32 %v239_v40, %v238_v32 }
  0xc3   : > { %v268_v49 = vadd.f32 %v267_v41, %v229_v33  ;;  %v274_v50 = vadd.f32 %v273_v42, %v230_v34  ;;  %v244_v51 = vadd.f32 %v243_v43, %v225_v35  ;;  %v250_v52 = vadd.f32 %v249_v44, %v226_v36 }
  0xc4   : > { %v259_v53 = vrot.slane %v258_v45, 1  ;;  %v265_v54 = vrot.slane %v264_v46, 1  ;;  %v235_v55 = vrot.slane %v234_v47, 1  ;;  %v241_v56 = vrot.slane %v240_v48, 1 }
  0xc5   : > { %v269_v57 = vrot.slane %v268_v49, 2  ;;  %v275_v58 = vrot.slane %v274_v50, 2  ;;  %v245_v59 = vrot.slane %v244_v51, 2  ;;  %v251_v60 = vrot.slane %v250_v52, 2 }
  0xc6   : > { %v260_v62 = vadd.f32 %v259_v53, %v258_v45  ;;  %v266_v63 = vadd.f32 %v265_v54, %v264_v46  ;;  %v236_v0 = vadd.f32 %v235_v55, %v234_v47  ;;  %v242_v1 = vadd.f32 %v241_v56, %v240_v48 }
  0xc7   : > { %v270_v2 = vadd.f32 %v269_v57, %v268_v49  ;;  %v276_v3 = vadd.f32 %v275_v58, %v274_v50  ;;  %v246_v4 = vadd.f32 %v245_v59, %v244_v51  ;;  %v252_v5 = vadd.f32 %v251_v60, %v250_v52 }
  0xc8   : > { %v283_v11 = vrot.slane %v282_v61, 1  ;;  %v284_v12 = vrot.slane %v282_v61, 2  ;;  %v285_v14 = vrot.slane %v282_v61, 3  ;;  %v290_v15 = vadd.f32 %v282_v61, %v236_v0 }
  0xc9   : > { %v271_v16 = vrot.slane %v270_v2, 1  ;;  %v277_v17 = vrot.slane %v276_v3, 1  ;;  %v247_v20 = vrot.slane %v246_v4, 1  ;;  %v253_v21 = vrot.slane %v252_v5, 1 }
  0xca   : > { %v291_v22 = vadd.f32 %v282_v61, %v242_v1  ;;  %v301_v23 = vrot.slane %v290_v15, %v906_v28  ;;  %v294_v26 = vadd.f32 %v284_v12, %v260_v62  ;;  %v295_v27 = vadd.f32 %v284_v12, %v266_v63 }
  0xcb   : > { %v272_v29 = vadd.f32 %v271_v16, %v270_v2  ;;  %v278_v30 = vadd.f32 %v277_v17, %v276_v3  ;;  %v248_v31 = vadd.f32 %v247_v20, %v246_v4  ;;  %v254_v32 = vadd.f32 %v253_v21, %v252_v5 }
  0xcc   : > { %v305_v33 = vrot.slane %v291_v22, %v906_v28  ;;  %v330_v34 = vmul.f32 %v301_v23, %v881_v9  ;;  %v317_v40 = vrot.slane %v294_v26, %v906_v28  ;;  %v321_v41 = vrot.slane %v295_v27, %v906_v28 }
  0xcd   : > { %v292_v35 = vadd.f32 %v283_v11, %v248_v31  ;;  %v293_v36 = vadd.f32 %v283_v11, %v254_v32  ;;  %v296_v37 = vadd.f32 %v285_v14, %v272_v29  ;;  %v297_v38 = vadd.f32 %v285_v14, %v278_v30 }
  0xce   : > { %v331_v39 = vmul.f32 %v305_v33, %v884_v10  ;;  %v334_v51 = vmul.f32 %v317_v40, %v875_v7  ;;  %v335_v52 = vmul.f32 %v321_v41, %v878_v8  ;;  %v718_v16 = vmov 1983009808  }
  0xcf   : > { %v309_v42 = vrot.slane %v292_v35, %v906_v28  ;;  %v313_v43 = vrot.slane %v293_v36, %v906_v28  ;;  %v325_v44 = vrot.slane %v296_v37, %v906_v28  ;;  %v329_v45 = vrot.slane %v297_v38, %v906_v28 }
  0xd0   : > { %v338_v46 = vadd.f32 %v331_v39, %v330_v34  ;;  %v344_v53 = vadd.f32 %v335_v52, %v334_v51  ;;  %v359_v28 = vand.u32 127, %v298_v6  ;;  %v419_v17 = vunpack.c.l.s4 %v718_v16 }
  0xd1   : > { %v332_v9 = vmul.f32 %v309_v42, %v900_v24  ;;  %v333_v47 = vmul.f32 %v313_v43, %v903_v25  ;;  %v336_v48 = vmul.f32 %v325_v44, %v894_v18  ;;  %v337_v10 = vmul.f32 %v329_v45, %v897_v19 }
  0xd2   : > { %339 = vadd.xlane.f32.xlu1 %v338_v46  ;;  %v362_v24 = vsub.s32 %v359_v28, %v887_v13  ;;  %v719_v20 = vmov 1934713408   ;;  %v420_v22 = vunpack.c.0.s8 %v419_v17  ;;  %v720_v36 = vmov 0.0  }
  0xd3   : > { %v341_v49 = vadd.f32 %v333_v47, %v332_v9  ;;  %v347_v50 = vadd.f32 %v337_v10, %v336_v48  ;;  %v427_v21 = vunpack.c.l.s4 %v719_v20 }
  0xd4   : > { %v423_v31 = vsub.s32 %v420_v22, %v887_v13 }
  0xd5   : > { %342 = vadd.xlane.f32.xlu0 %v341_v49  ;;  %v428_v27 = vunpack.c.0.s8 %v427_v21 }
  0xd6   : > { %348 = vadd.xlane.f32.xlu1 %v347_v50 }
  0xd7   : > { %v431_v33 = vsub.s32 %v428_v27, %v887_v13 }
  0xd9   : > { %345 = vadd.xlane.f32.xlu0 %v344_v53 }
 0x15f   : > { %v340_v25 = vpop.xlane.xlu1 %339 }
 0x160   : > { %v400_v54 = vrot.slane %v340_v25, %v362_v24  ;;  %v350_v57 = vmul.f32 %v340_v25, %v340_v25 }
 0x162   : > { %v343_v18 = vpop.xlane.xlu0 %342  ;;  %v363_v6 = vrot.slane %v350_v57, %v362_v24 }
 0x163   : > { %v351_v19 = vmul.f32 %v343_v18, %v343_v18  ;;  %v404_v55 = vrot.slane %v343_v18, %v362_v24  ;;  %v349_v56 = vpop.xlane.xlu1 %348 }
 0x164   : > { %v353_v8 = vmul.f32 %v349_v56, %v349_v56  ;;  %v412_v62 = vrot.slane %v349_v56, %v362_v24 }
 0x165   : > { %v413_v7 = vsel %vm376_vm0, %v404_v55, %v400_v54  ;;  %v367_v58 = vrot.slane %v351_v19, %v362_v24 }
 0x166   : > { %v346_v59 = vpop.xlane.xlu0 %345  ;;  %v375_v1 = vrot.slane %v353_v8, %v362_v24 }
 0x167   : > { %v352_v60 = vmul.f32 %v346_v59, %v346_v59  ;;  %v408_v61 = vrot.slane %v346_v59, %v362_v24  ;;  %v377_v2 = vsel %vm376_vm0, %v367_v58, %v363_v6 }
 0x169   : > { %v371_v63 = vrot.slane %v352_v60, %v362_v24  ;;  %v414_v0 = vsel %vm378_vm1, %v408_v61, %v413_v7 }
 0x16a   : > { %v415_v3 = vsel %vm380_vm2, %v412_v62, %v414_v0 }
 0x16b   : > { %v379_v4 = vsel %vm378_vm1, %v371_v63, %v377_v2 }
 0x16c   : > { %v381_v5 = vsel %vm380_vm2, %v375_v1, %v379_v4 }
 0x16d   : > { %v384_v11 = vsel %vm383_vm3, %v381_v5, 0.0 }
 0x16e   : > { %385 = vadd.xlane.f32.xlu0 %v384_v11 }
 0x1fb   : > { %v386_v12 = vpop.xlane.xlu0 %385 }
 0x1fc   : > { %v387_v14 = vadd.f32 1.0, %v386_v12  ;;  %v390_v15 = vadd.f32 1e-07, %v386_v12 }
 0x1fe   : > { %612 = vrcp.f32 %v387_v14 }
 0x1ff   : > { %614 = vrsqrt.f32 %v390_v15 }
 0x208   : > { %v613_v23 = vpop.eup %612 }
 0x209   : > { %v389_v26 = vmul.f32 %v613_v23, %v386_v12  ;;  %v615_v29 = vpop.eup %614 }
 0x20b   : > { %v392_v30 = vmul.f32 %v615_v29, %v389_v26 }
 0x20d   : > { %v417_v32 = vmul.f32 %v415_v3, %v392_v30 }
 0x20f   : > { %v424_v34 = vrot.slane %v417_v32, %v423_v31 }
 0x211   : > { %v432_v35 = vrot.slane %v424_v34, %v431_v33  ;;  %v425_v37 = vcombine.high %v424_v34, %v720_v36 }
 0x213   : > { %v440_v38 = vcombine.high %v432_v35, %v720_v36  ;;  %v439_v39 = vrot.slane %v425_v37, %v431_v33 }
 0x215   : > { %443 = vrot.lane.b32.xlu1 %v440_v38, %s721_s27  ;;  %447 = vrot.lane.b32.xlu0 %v439_v39, %s722_s28  ;;  %v441_v40 = vcombine.high %v439_v39, %v720_v36 }
 0x219   : > { %451 = vrot.lane.b32.xlu1 %v441_v40, %s723_s29 }
 0x287   : > { %v444_v41 = vpop.permute.xlu1 %443  ;;  %v448_v13 = vpop.permute.xlu0 %447 }
 0x288   : > { %v455_v42 = vsel %vm454_vm4, %v432_v35, %v444_v41 }
 0x289   : > { %v457_v43 = vsel %vm456_vm5, %v455_v42, %v448_v13 }
 0x28b   : > { %v452_v44 = vpop.permute.xlu1 %451 }
 0x28c   : > { %v459_v45 = vsel %vm458_vm6, %v457_v43, %v452_v44 }
 0x28d   : > { %461 = vst.msk [vmem:[%s188_s9] sm:$0x1] %vm460_vm7, %v459_v45 }
 0x28e   : > { %659 = shalt.err (!%p656_p2)
}
 0x28f   : > { %s660_s5 = scalar_lea.hbm %s939_s6, 16  ;;  %s664_s22 = scalar_lea.hbm %s986_s3, 32 }
 0x290   : > { %p661_p4 = scmp.ne.s32.totalorder %s939_s6, %s660_s5  ;;  %p665_p9 = scmp.lt.u32.totalorder %s939_s6, %s986_s3 }
 0x291   : > { %p666_p1 = scmp.lt.u32.totalorder %s664_s22, %s660_s5  ;;  %p668_p6 = scmp.lt.u32.totalorder %s660_s5, %s939_s6 }
 0x292   : > { %p662_p5 = pnand %p661_p4, %p993_p11 }
 0x293   : > { %p667_p3 = por %p666_p1, %p665_p9 }
 0x294   : > { %p663_p7 = pneg %p662_p5 }
 0x295   : > { %p669_p12 = por %p668_p6, %p667_p3 }
 0x297   : > { %p670_p13 = pnand %p669_p12, %p663_p7 }
 0x299   : > { %673 = shalt.err (!%p670_p13)
}
 0x29a   : > { %557 = dma.vmem_to_hbm [thread:$0]  (%p993_p11), %s941_s10, 16, %s939_s6, %s463_s7  }
 0x29b PF: > { %s487_s28 = sand.u32 1, %s700_s12   ;;  %p994_p8 = scmp.ne.s32.totalorder %s991_s25, 0 }
 0x29c   : > { %p995_p10 = scmp.ge.s32.totalorder %s712_s15, 2  ;;  %s488_s29 = scalar_lea.sflag [#allocation4], %s487_s28 }
 0x29e   : > { %p564_p0 = pnand %p995_p10, %p994_p8 }
 0x2a0   : > { %695 = dma.done.wait (!%p564_p0), %s488_s29, 16  }
 0x2a1   : > { %697 = vsyncadd (!%p564_p0), %s488_s29, 4294967280  ;;  %p16_p2 = scmp.ge.s32.totalorder %s770_s18, 4   ;;  %s996_s12 = smov %s704_s13 }
 0x2a2   : > { %s997_s13 = smov %s708_s14  ;;  %s998_s14 = smov %s782_s21 }
 0x2a3   : > { %s999_s15 = smov %s770_s18  ;;  %18 = sbr.rel (!%p16_p2) target bundleno = 5 (0x5), region = 77 }
 0x2aa   :  { %492 = vsyncpa [#allocation3], 1 }
 0x2ab   :  { %494 = vsyncpa [#allocation3 + $0x1], 1 }
 0x2ac   :  { %495 = vsyncpa [#allocation4], 1 }
 0x2ad   :  { %497 = vsyncpa [#allocation4 + $0x1], 1 }

</bundles_post_ra>
